<compile_context>
chip_gen: v7x
topology: tpu7x:2x2x1
jax: 0.10.0
libtpu: 0.0.40
codegen_flags: <defaults>
</compile_context>

<pallas_src>
import functools

import jax
import jax.numpy as jnp
from jax.experimental import pallas as pl
from jax.experimental.pallas import tpu as pltpu


# ---------------------------------------------------------------------------
# Kernels
# ---------------------------------------------------------------------------

def _se_fused_kernel(x_ref, w1_ref, w2_ref, o_ref, *, inv_hw):
    """Single-pass SE for a (bb, C, HW) block: pool -> FC -> sigmoid -> scale."""
    x = x_ref[...]                                                # input dtype
    # Squeeze: global average pool over the spatial (lane) axis, f32 accumulate.
    v = jnp.sum(x, axis=-1, dtype=jnp.float32) * inv_hw           # (bb, C)
    # Excitation: FC -> ReLU -> FC -> Sigmoid (weights already f32).
    h = jnp.maximum(
        jnp.dot(v, w1_ref[...], preferred_element_type=jnp.float32), 0.0)
    s = jax.nn.sigmoid(
        jnp.dot(h, w2_ref[...], preferred_element_type=jnp.float32))  # (bb, C)
    # Scale: f32 multiply (reference precision), cast only at the store.
    o_ref[...] = (x.astype(jnp.float32) * s[:, :, None]).astype(o_ref.dtype)


def _pool_kernel(x_ref, v_ref, *, inv_hw):
    """Fallback pass 1: accumulate per-channel mean across HW tiles."""
    @pl.when(pl.program_id(1) == 0)
    def _():
        v_ref[...] = jnp.zeros_like(v_ref)
    v_ref[...] += (
        jnp.sum(x_ref[...], axis=-1, dtype=jnp.float32, keepdims=True) * inv_hw)


def _scale_kernel(x_ref, s_ref, o_ref):
    """Fallback pass 2: out = x * gate, gate broadcast over the lane axis."""
    o_ref[...] = (x_ref[...].astype(jnp.float32) * s_ref[...]).astype(o_ref.dtype)


# ---------------------------------------------------------------------------
# Wrapper helpers
# ---------------------------------------------------------------------------

def _vmem_budgets():
    """(per-step block budget bytes, vmem_limit_bytes) per TPU generation."""
    vmem_cap = 128 * 1024 * 1024
    try:
        vmem_cap = int(pltpu.get_tpu_info().vmem_capacity_bytes)
    except Exception:
        pass
    if vmem_cap <= 64 * 1024 * 1024:               # v7x-class: 64 MiB per TC
        return 20 * 1024 * 1024, 48 * 1024 * 1024
    return 28 * 1024 * 1024, 96 * 1024 * 1024       # v5e / v6e: 128 MiB VMEM


def _batch_semantics(grid_len):
    """CORE_PARALLEL on v7x (2 TCs/chip) when the grid splits evenly."""
    kind = ""
    try:
        kind = jax.devices()[0].device_kind.lower()
    except Exception:
        pass
    if "v7" in kind and grid_len % 2 == 0 and hasattr(pltpu, "CORE_PARALLEL"):
        return pltpu.CORE_PARALLEL
    return "parallel"


def _divisors(n):
    small, large = set(), set()
    i = 1
    while i * i <= n:
        if n % i == 0:
            small.add(i)
            large.add(n // i)
        i += 1
    return sorted(small | large)


# ---------------------------------------------------------------------------
# Public entry point
# ---------------------------------------------------------------------------

def se_block(x, w1, w2):
    """SE block forward.

    x:  (B, C, H, W) NCHW.
    w1: (C, C // r)  first Linear weight, pre-transposed to (in, out)
                     (i.e. torch_linear1.weight.T).
    w2: (C // r, C)  second Linear weight, (in, out) (torch_linear2.weight.T).
    """
    B, C, H, W = x.shape
    HW = H * W
    Cr = w1.shape[1]
    assert w1.shape[0] == C and w2.shape == (Cr, C), (
        "w1/w2 must be pre-transposed to (in, out): pass torch weight.T")

    w1 = w1.astype(jnp.float32)
    w2 = w2.astype(jnp.float32)

    x3 = x.reshape(B, C, HW)                 # free reshape, no transpose
    itemsize = jnp.dtype(x.dtype).itemsize
    inv_hw = 1.0 / HW

    budget, vmem_limit = _vmem_budgets()
    per_batch = 2 * 2 * C * HW * itemsize    # (x + out) double-buffered
    w_bytes = 2 * 4 * (C * Cr + Cr * C)      # double-buffered f32 weights

    # ---- fast path: whole samples fit in VMEM -> single fused pass ---------
    if per_batch + w_bytes <= budget:
        # Keep >= min(B, 4) grid steps so double-buffering (and the v7x core
        # split) stays alive; within that cap take the largest divisor of B.
        bb_cap = max(1, B // min(B, 4))
        bb = 1
        for cand in range(1, bb_cap + 1):
            if B % cand == 0 and cand * per_batch + w_bytes <= budget:
                bb = cand
        grid_len = B // bb

        kernel = functools.partial(_se_fused_kernel, inv_hw=inv_hw)
        out3 = pl.pallas_call(
            kernel,
            out_shape=jax.ShapeDtypeStruct((B, C, HW), x.dtype),
            grid=(grid_len,),
            in_specs=[
                # Last two block dims equal the full array extents (C, HW),
                # so the (8, 128) divisibility rule does not apply.
                pl.BlockSpec((bb, C, HW), lambda b: (b, 0, 0)),
                pl.BlockSpec((C, Cr), lambda b: (0, 0)),
                pl.BlockSpec((Cr, C), lambda b: (0, 0)),
            ],
            out_specs=pl.BlockSpec((bb, C, HW), lambda b: (b, 0, 0)),
            compiler_params=pltpu.CompilerParams(
                dimension_semantics=(_batch_semantics(grid_len),),
                vmem_limit_bytes=vmem_limit,
            ),
        )(x3, w1, w2)
        return out3.reshape(B, C, H, W)

    # ---- fallback: one sample exceeds VMEM -> two streaming passes ---------
    # Pass 1 accumulates the per-channel mean over HW tiles; the tiny gate is
    # computed in plain JAX; pass 2 streams x again and applies the gate.
    def fits(blk):
        return 2 * 2 * C * blk * itemsize <= budget

    hw_blk = 0
    best_any = 1
    for d in _divisors(HW):
        if fits(d):
            best_any = d
            if d % 128 == 0 or d == HW:
                hw_blk = d
    if hw_blk == 0:
        # TODO(synk): no 128-aligned divisor of H*W fits VMEM; use the largest
        # fitting divisor instead (may cost masked stores on the lane axis).
        hw_blk = best_any
    n_hw = HW // hw_blk

    pool = pl.pallas_call(
        functools.partial(_pool_kernel, inv_hw=inv_hw),
        out_shape=jax.ShapeDtypeStruct((B, C, 1), jnp.float32),
        grid=(B, n_hw),
        in_specs=[pl.BlockSpec((1, C, hw_blk), lambda b, h: (b, 0, h))],
        out_specs=pl.BlockSpec((1, C, 1), lambda b, h: (b, 0, 0)),
        compiler_params=pltpu.CompilerParams(
            dimension_semantics=("parallel", "arbitrary"),
            vmem_limit_bytes=vmem_limit,
        ),
    )(x3)

    v = pool.reshape(B, C)
    h = jnp.maximum(v @ w1, 0.0)
    s3 = jax.nn.sigmoid(h @ w2).astype(jnp.float32).reshape(B, C, 1)

    out3 = pl.pallas_call(
        _scale_kernel,
        out_shape=jax.ShapeDtypeStruct((B, C, HW), x.dtype),
        grid=(B, n_hw),
        in_specs=[
            pl.BlockSpec((1, C, hw_blk), lambda b, h: (b, 0, h)),
            pl.BlockSpec((1, C, 1), lambda b, h: (b, 0, 0)),
        ],
        out_specs=pl.BlockSpec((1, C, hw_blk), lambda b, h: (b, 0, h)),
        compiler_params=pltpu.CompilerParams(
            dimension_semantics=("parallel", "parallel"),
            vmem_limit_bytes=vmem_limit,
        ),
    )(x3, s3)
    return out3.reshape(B, C, H, W)


def se_block_reference(x, w1, w2):
    """Pure-JAX reference mirroring the PyTorch module."""
    v = jnp.mean(x.astype(jnp.float32), axis=(2, 3))       # (B, C)
    h = jnp.maximum(v @ w1.astype(jnp.float32), 0.0)        # (B, C//r)
    s = jax.nn.sigmoid(h @ w2.astype(jnp.float32))          # (B, C)
    return (x.astype(jnp.float32) * s[:, :, None, None]).astype(x.dtype)


if __name__ == "__main__":
    B, C, H, W = 2, 4, 16, 16
    reduction = 2
    Cr = C // reduction

    key = jax.random.PRNGKey(0)
    kx, k1, k2 = jax.random.split(key, 3)

    x = jax.random.normal(kx, (B, C, H, W), dtype=jnp.float32)
    # PyTorch Linear stores weight as (out, in); here we pass the transposed,
    # matmul-ready (in, out) layout (i.e. torch weight.T).
    w1 = jax.random.normal(k1, (C, Cr), dtype=jnp.float32) * 0.5
    w2 = jax.random.normal(k2, (Cr, C), dtype=jnp.float32) * 0.5

    out = jax.block_until_ready(se_block(x, w1, w2))
    ref = se_block_reference(x, w1, w2)
    assert out.shape == (B, C, H, W)
    assert jnp.allclose(out, ref, atol=1e-5, rtol=1e-5)

    print("KERNEL_OK")
</pallas_src>

<mosaic_0001>
module attributes {stable_mosaic.version = 11 : i64} {
  func.func @_se_fused_kernel(%arg0: i32, %arg1: memref<1x4x256xf32, #tpu.memory_space<vmem>>, %arg2: memref<4x2xf32, #tpu.memory_space<vmem>>, %arg3: memref<2x4xf32, #tpu.memory_space<vmem>>, %arg4: memref<1x4x256xf32, #tpu.memory_space<vmem>>) attributes {dimension_semantics = [#tpu.dimension_semantics<parallel>], iteration_bounds = array<i64: 2>, scalar_prefetch = 0 : i64, scratch_operands = 0 : i64, tpu.core_type = #tpu.core_type<tc>, window_params = [{transform_indices = @transform_0, window_bounds = array<i64: 1, 4, 256>}, {pipeline_mode = #tpu.pipeline_mode<synchronous>, transform_indices = @transform_1, window_bounds = array<i64: 4, 2>}, {pipeline_mode = #tpu.pipeline_mode<synchronous>, transform_indices = @transform_2, window_bounds = array<i64: 2, 4>}, {transform_indices = @transform_3, window_bounds = array<i64: 1, 4, 256>}]} {
    %c0 = arith.constant 0 : index
    %c0_0 = arith.constant 0 : index
    %c0_1 = arith.constant 0 : index
    %0 = vector.load %arg1[%c0, %c0_0, %c0_1] : memref<1x4x256xf32, #tpu.memory_space<vmem>>, vector<1x4x256xf32>
    %cst = arith.constant dense<0.000000e+00> : vector<1x4xf32>
    %1 = vector.multi_reduction <add>, %0, %cst [2] : vector<1x4x256xf32> to vector<1x4xf32>
    %cst_2 = arith.constant 3.906250e-03 : f32
    %2 = vector.broadcast %cst_2 : f32 to vector<1x4xf32>
    %3 = arith.mulf %1, %2 : vector<1x4xf32>
    %c0_3 = arith.constant 0 : index
    %c0_4 = arith.constant 0 : index
    %4 = vector.load %arg2[%c0_3, %c0_4] : memref<4x2xf32, #tpu.memory_space<vmem>>, vector<4x2xf32>
    %cst_5 = arith.constant dense<0.000000e+00> : vector<1x2xf32>
    %5 = tpu.matmul %3, %4, %cst_5 {dimension_numbers = #tpu.dot_dimension_numbers<[1], [0], [0], [1], [0, 0, 1, 1], [], []>} : vector<1x4xf32>, vector<4x2xf32>, vector<1x2xf32> -> vector<1x2xf32>
    %cst_6 = arith.constant 0.000000e+00 : f32
    %6 = vector.broadcast %cst_6 : f32 to vector<1x2xf32>
    %7 = arith.maximumf %5, %6 : vector<1x2xf32>
    %c0_7 = arith.constant 0 : index
    %c0_8 = arith.constant 0 : index
    %8 = vector.load %arg3[%c0_7, %c0_8] : memref<2x4xf32, #tpu.memory_space<vmem>>, vector<2x4xf32>
    %cst_9 = arith.constant dense<0.000000e+00> : vector<1x4xf32>
    %9 = tpu.matmul %7, %8, %cst_9 {dimension_numbers = #tpu.dot_dimension_numbers<[1], [0], [0], [1], [0, 0, 1, 1], [], []>} : vector<1x2xf32>, vector<2x4xf32>, vector<1x4xf32> -> vector<1x4xf32>
    %10 = arith.negf %9 : vector<1x4xf32>
    %11 = math.exp %10 : vector<1x4xf32>
    %cst_10 = arith.constant 1.000000e+00 : f32
    %12 = vector.broadcast %cst_10 : f32 to vector<1x4xf32>
    %13 = arith.addf %12, %11 : vector<1x4xf32>
    %14 = arith.divf %12, %13 : vector<1x4xf32>
    %15 = vector.shape_cast %14 : vector<1x4xf32> to vector<1x4x1xf32>
    %16 = vector.broadcast %15 : vector<1x4x1xf32> to vector<1x4x256xf32>
    %17 = arith.mulf %0, %16 : vector<1x4x256xf32>
    %c0_11 = arith.constant 0 : index
    %c0_12 = arith.constant 0 : index
    %c0_13 = arith.constant 0 : index
    %18 = vector.load %arg4[%c0_11, %c0_12, %c0_13] : memref<1x4x256xf32, #tpu.memory_space<vmem>>, vector<1x4x256xf32>
    tpu.vector_store %arg4[%c0_11, %c0_12, %c0_13], %17 {strides = array<i32>} : memref<1x4x256xf32, #tpu.memory_space<vmem>>, vector<1x4x256xf32>,
    return
  }
  func.func @transform_0(%arg0: i32) -> (i32, i32, i32) {
    %c0_i32 = arith.constant 0 : i32
    %c0_i32_0 = arith.constant 0 : i32
    %c0_i32_1 = arith.constant 0 : i32
    return %arg0, %c0_i32, %c0_i32_0 : i32, i32, i32
  }
  func.func @transform_1(%arg0: i32) -> (i32, i32) {
    %c0_i32 = arith.constant 0 : i32
    %c0_i32_0 = arith.constant 0 : i32
    %c0_i32_1 = arith.constant 0 : i32
    return %c0_i32, %c0_i32_0 : i32, i32
  }
  func.func @transform_2(%arg0: i32) -> (i32, i32) {
    %c0_i32 = arith.constant 0 : i32
    %c0_i32_0 = arith.constant 0 : i32
    %c0_i32_1 = arith.constant 0 : i32
    return %c0_i32, %c0_i32_0 : i32, i32
  }
  func.func @transform_3(%arg0: i32) -> (i32, i32, i32) {
    %c0_i32 = arith.constant 0 : i32
    %c0_i32_0 = arith.constant 0 : i32
    %c0_i32_1 = arith.constant 0 : i32
    return %arg0, %c0_i32, %c0_i32_0 : i32, i32, i32
  }
}

</mosaic_0001>

<bundles_post_ra>
// kernel: tpu_custom_call.1
= control target key start
LH: loop header
LB: loop body
LE: loop exit
PB: predicated region body
PF: predicated region fallthrough
CT: control target
= control target key end

     0   :  { %8 = vsyncpa [#allocation3], 0  ;;  %s1043_s0 = inlined_call_operand.hbm [shape: f32[2,4,256], index: 0, kind: input, shape index: {}]   ;;  %s1044_s1 = inlined_call_operand.hbm [shape: f32[4,2], index: 1, kind: input, shape index: {}]   ;;  %s1045_s2 = inlined_call_operand.hbm [shape: f32[2,4], index: 2, kind: input, shape index: {}]   ;;  %s1046_s3 = inlined_call_operand.hbm [shape: f32[2,4,256], index: 3, kind: output, shape index: {}]  }
   0x1   :  { %10 = vsyncpa [#allocation3 + $0x1], 0 }
   0x2   :  { %11 = vsyncpa [#allocation6], 0 }
   0x3   :  { %12 = vsyncpa [#allocation4], 0 }
   0x4   :  { %14 = vsyncpa [#allocation4 + $0x1], 0  ;;  %s814_s12 = smov 0   ;;  %s816_s13 = smov 0  }
   0x5   :  { %s818_s14 = smov 0   ;;  %s820_s15 = smov 0  }
   0x6 LB: > { %s835_s16 = sadd.s32 4294967295, %s785_s15   ;;  %s515_s17 = sadd.s32 4294967294, %s785_s15   ;;  %s785_s15 = sphi %s820_s15, %s1066_s15   ;;  %s781_s14 = sphi %s818_s14, %s1065_s14   ;;  %s777_s13 = sphi %s816_s13, %s1064_s13   ;;  %s773_s12 = sphi %s814_s12, %s1063_s12  }
   0x7   : > { %p40_p0 = scmp.ne.s32.totalorder %s777_s13, %s773_s12  ;;  %p1047_p1 = scmp.eq.s32.totalorder %s835_s16, 0 }
   0x8   : > { %p112_p3 = scmp.eq.s32.totalorder %s515_s17, 1  ;;  %p516_p5 = scmp.ge.s32.totalorder %s785_s15, 1 }
   0x9   : > { %p844_p4 = por %p1047_p1, %p40_p0  ;;  %p119_p7 = scmp.lt.s32.totalorder %s785_s15, 3 }
   0xa   : > { %p849_p6 = por %p112_p3, %p40_p0  ;;  %s787_s21 = smov [#allocation5]  }
   0xb   : > { %s1050_s18 = scalar_select %p844_p4, 1, 0 }
   0xc   : > { %s1051_s19 = scalar_select %p849_p6, 1, 0 }
   0xd   : > { %p854_p8 = pnand %p516_p5, %p119_p7  ;;  %s132_s22 = sshll.u32 %s787_s21, 4  ;;  %s133_s22 = int_to_ptr.vmem [resolvable:$true] %s132_s22 }
   0xe   : > { %s788_s23 = smov [#allocation7]   ;;  %s870_s26 = sadd.s32 1, %s785_s15  }
   0xf   : > { %s1052_s20 = scalar_select %p854_p8, 1, 0 }
  0x10   : > { %p566_p10 = pneg %p854_p8  ;;  %s143_s24 = sshll.u32 %s788_s23, 4  ;;  %s867_s24 = int_to_ptr.vmem [resolvable:$true] %s143_s24 }
  0x11   : > { %s24_s27 = ssub.s32 %s785_s15, %s870_s26  ;;  %s629_s30 = scalar_lea.hbm %s1044_s1, 64 }
  0x12   : > { %p863_p11 = pnand %p566_p10, %p1047_p1  ;;  %p630_p12 = scmp.ne.s32.totalorder %s1044_s1, %s629_s30 }
  0x13   : > { %p636_p5 = scmp.lt.u32.totalorder %s629_s30, %s1044_s1 }
  0x14   : > { %p631_p13 = pneg %p863_p11 }
  0x16   : > { %p632_p0 = pnand %p631_p13, %p630_p12 }
  0x18   : > { %p633_p3 = pneg %p632_p0 }
  0x1a   : > { %p638_p7 = pnand %p636_p5, %p633_p3 }
  0x1c   : > { %641 = shalt.err (!%p638_p7)
}
  0x1d   : > { %s642_s8 = scalar_lea.vmem %s133_s22, 64  ;;  %p650_p2 = scmp.lt.s32.totalorder %s133_s22, %s133_s22 }
  0x1e   : > { %p643_p10 = scmp.ne.s32.totalorder %s133_s22, %s642_s8  ;;  %p651_p6 = scmp.lt.s32.totalorder %s642_s8, %s642_s8 }
  0x20   : > { %p645_p9 = pnand %p643_p10, %p631_p13  ;;  %p652_p4 = por %p651_p6, %p650_p2 }
  0x22   : > { %p646_p1 = pneg %p645_p9 }
  0x24   : > { %p653_p8 = pnand %p652_p4, %p646_p1 }
  0x26   : > { %656 = shalt.err (!%p653_p8)
}
  0x27   : > { %569 = dma.hbm_to_vmem [thread:$0]  (!%p863_p11), %s1044_s1, 64, %s133_s22, [#allocation6]  }
  0x28   : > { %s657_s21 = scalar_lea.hbm %s1045_s2, 32 }
  0x29   : > { %p658_p9 = scmp.ne.s32.totalorder %s1045_s2, %s657_s21  ;;  %p664_p4 = scmp.lt.u32.totalorder %s657_s21, %s1045_s2 }
  0x2b   : > { %p660_p2 = pnand %p658_p9, %p631_p13 }
  0x2d   : > { %p661_p1 = pneg %p660_p2 }
  0x2f   : > { %p666_p6 = pnand %p664_p4, %p661_p1 }
  0x31   : > { %669 = shalt.err (!%p666_p6)
}
  0x32   : > { %s670_s22 = scalar_lea.vmem %s867_s24, 32  ;;  %p678_p3 = scmp.lt.s32.totalorder %s867_s24, %s867_s24 }
  0x33   : > { %p671_p8 = scmp.ne.s32.totalorder %s867_s24, %s670_s22  ;;  %p679_p5 = scmp.lt.s32.totalorder %s670_s22, %s670_s22 }
  0x35   : > { %p673_p12 = pnand %p671_p8, %p631_p13  ;;  %p680_p7 = por %p679_p5, %p678_p3 }
  0x37   : > { %p674_p0 = pneg %p673_p12 }
  0x39   : > { %p681_p10 = pnand %p680_p7, %p674_p0 }
  0x3b   : > { %684 = shalt.err (!%p681_p10)
}
  0x3c   : > { %572 = dma.hbm_to_vmem [thread:$0]  (!%p863_p11), %s1045_s2, 32, %s867_s24, [#allocation6]  }
  0x3d   : > { %p25_p13 = scmp.eq.s32.totalorder %s24_s27, 0  ;;  %s27_s6 = sadd.s32 1, %s781_s14 }
  0x3e   : > { %p34_p9 = scmp.ne.s32.totalorder %s781_s14, %s777_s13  ;;  %p35_p2 = scmp.eq.s32.totalorder %s785_s15, 0 }
  0x3f   : > { %s929_s25 = scalar_select %p25_p13, %s781_s14, %s27_s6  }
  0x40   : > { %p36_p1 = por %p35_p2, %p34_p9  ;;  %p1054_p4 = scmp.eq.s32.totalorder %s835_s16, 1 }
  0x41   : > { %p583_p8 = scmp.lt.s32.totalorder %s785_s15, 2  ;;  %s154_s8 = sand.u32 1, %s781_s14  }
  0x42   : > { %p933_p6 = por %p1054_p4, %p34_p9  ;;  %s520_s9 = sshll.u32 %s154_s8, 3 }
  0x43   : > { %s538_s10 = sshll.u32 %s785_s15, 7  ;;  %s158_s27 = scalar_lea.vmem [#allocation2], %s520_s9 }
  0x44   : > { %s943_s24 = scalar_lea.hbm %s1043_s0, %s538_s10  ;;  %s166_s21 = sshll.u32 %s158_s27, 4  ;;  %s945_s21 = int_to_ptr.vmem [resolvable:$true] %s166_s21 }
  0x45   : > { %p947_p11 = pnand %p583_p8, %p36_p1  ;;  %s155_s28 = scalar_lea.sflag [#allocation3], %s154_s8 }
  0x46   : > { %s685_s29 = scalar_lea.hbm %s943_s24, 128  ;;  %s690_s4 = scalar_lea.hbm %s1043_s0, 256 }
  0x47   : > { %p686_p12 = scmp.ne.s32.totalorder %s943_s24, %s685_s29  ;;  %p687_p0 = pneg %p947_p11 }
  0x48   : > { %p691_p7 = scmp.lt.u32.totalorder %s943_s24, %s1043_s0  ;;  %p692_p10 = scmp.lt.u32.totalorder %s690_s4, %s685_s29 }
  0x49   : > { %p688_p3 = pnand %p687_p0, %p686_p12  ;;  %p694_p9 = scmp.lt.u32.totalorder %s685_s29, %s943_s24 }
  0x4a   : > { %p693_p13 = por %p692_p10, %p691_p7 }
  0x4b   : > { %p689_p5 = pneg %p688_p3 }
  0x4c   : > { %p695_p2 = por %p694_p9, %p693_p13 }
  0x4e   : > { %p696_p1 = pnand %p695_p2, %p689_p5 }
  0x50   : > { %699 = shalt.err (!%p696_p1)
}
  0x51   : > { %s700_s8 = scalar_lea.vmem %s945_s21, 128  ;;  %s789_s9 = smov [#allocation2]  }
  0x52   : > { %p701_p4 = scmp.ne.s32.totalorder %s945_s21, %s700_s8  ;;  %s705_s10 = sshll.u32 %s789_s9, 4  ;;  %s706_s10 = int_to_ptr.vmem [resolvable:$false] %s705_s10 }
  0x53   : > { %s707_s11 = scalar_lea.vmem %s706_s10, 256  ;;  %p708_p3 = scmp.lt.s32.totalorder %s945_s21, %s706_s10 }
  0x54   : > { %p703_p8 = pnand %p701_p4, %p687_p0  ;;  %p709_p7 = scmp.lt.s32.totalorder %s707_s11, %s700_s8 }
  0x56   : > { %p704_p12 = pneg %p703_p8  ;;  %p710_p10 = por %p709_p7, %p708_p3 }
  0x58   : > { %p711_p13 = pnand %p710_p10, %p704_p12 }
  0x5a   : > { %714 = shalt.err (!%p711_p13)
}
  0x5b   : > { %576 = dma.hbm_to_vmem [thread:$0]  (!%p947_p11), %s943_s24, 128, %s945_s21, %s155_s28  }
  0x5c   : > { %p1057_p5 = scmp.ne.s32.totalorder %s1052_s20, 0 }
  0x5d   : > { %s979_s17 = sand.u32 (!%p1057_p5), 1, %s777_s13   ;;  %p1058_p0 = scmp.ne.s32.totalorder (!%p1057_p5), %s1050_s18, 0 }
  0x5e   : > { %175 = sbr.rel (%p1057_p5) target bundleno = 844 (0x34c), region = 32  ;;  %s524_s27 = sshll.u32 (!%p1057_p5), %s979_s17, 3 }
  0x5f   : > { %s178_s29 = scalar_lea.sflag (!%p1057_p5), [#allocation3], %s979_s17  ;;  %s181_s30 = scalar_lea.vmem (!%p1057_p5), [#allocation2], %s524_s27 }
  0x65   : > { %760 = dma.done.wait (%p1058_p0), %s178_s29, 128  }
  0x66   : > { %762 = vsyncadd (%p1058_p0), %s178_s29, 4294967168  ;;  %p1059_p11 = scmp.eq.s32.totalorder %s835_s16, 0 }
  0x68   : > { %764 = dma.done.wait (%p1059_p11), [#allocation6], 96   ;;  %p1060_p9 = pmov %p1059_p11 }
  0x69   : > { %vm216_vm0 = vcmask 1043456   ;;  %v212_v0 = vld [vmem:[%s181_s30] sm:$0xff]  ;;  %v790_v5 = vmov 0.0   ;;  %v223_v6 = vld [vmem:[#allocation5] sm:$0xf]  ;;  %vm791_vm1 = vmmov 0   ;;  %v225_v7 = vlaneseq }
  0x6a   : > { %766 = vsyncadd (%p1060_p9), [#allocation6], 4294967200  ;;  %v214_v1 = vcombine.high %v212_v0, %v212_v0  ;;  %v217_v2 = vsel %vm216_vm0, %v212_v0, 0.0  ;;  %544 = vmatprep.subr.mxu0 %v790_v5  ;;  %549 = vmatprep.subr.mxu1 %v790_v5  ;;  %vm231_vm2 = vcmask 31744   ;;  %v308_v14 = vld [vmem:[#allocation7] sm:$0x3] }
  0x6b   : > { %545 = vmatpush3.msk.msra.mxu0 %vm216_vm0, %v223_v6  ;;  %546 = vmatprep.mubr.msk.f32.mxu0 %vm791_vm1, %v790_v5  ;;  %v226_v8 = vand.u32 127, %v225_v7  ;;  %v228_v9 = vshrl.u32 %v225_v7, 7  ;;  %vm313_vm3 = vcmask 1041408   ;;  %vm309_vm4 = vcmask 15360   ;;  %s539_s18 = sshll.u32 %s835_s16, 7  ;;  %s211_s20 = scalar_lea.vmem [#allocation8], %s524_s27 }
  0x6c   : > { %v218_v3 = vsel %vm216_vm0, %v214_v1, 0.0  ;;  %551 = vmatprep.mubr.msk.f32.mxu1 %vm791_vm1, %v790_v5  ;;  %550 = vmatpush3.msk.msra.mxu1 %vm313_vm3, %v308_v14  ;;  %v792_v26 = vmov 839922192   ;;  %s426_s24 = sshll.u32 %s211_s20, 4  ;;  %s999_s28 = scalar_lea.hbm %s1046_s3, %s539_s18  ;;  %s1001_s24 = int_to_ptr.vmem [resolvable:$true] %s426_s24 }
  0x6d   : > { %v219_v4 = vadd.f32 %v218_v3, %v217_v2  ;;  %v229_v10 = vsub.s32 %v226_v8, %v228_v9  ;;  %v395_v23 = vsub.s32 0, %v228_v9  ;;  %v402_v27 = vunpack.c.l.s4 %v792_v26  ;;  %s412_s22 = scalar_lea.sflag [#allocation4], %s979_s17  ;;  %s715_s4 = scalar_lea.vmem %s1001_s24, 128 }
  0x6e   : > { %p716_p2 = scmp.ne.s32.totalorder %s1001_s24, %s715_s4  ;;  %s793_s16 = smov [#allocation8]  }
  0x6f   : > { %220 = vadd.xlane.f32.xlu0 %v219_v4  ;;  %v403_v28 = vunpack.c.0.s8 %v402_v27  ;;  %s719_s5 = sshll.u32 %s793_s16, 4  ;;  %s720_s5 = int_to_ptr.vmem [resolvable:$false] %s719_s5 }
  0x70   : > { %p717_p1 = pnand %p716_p2, %p933_p6  ;;  %s721_s6 = scalar_lea.vmem %s720_s5, 256 }
  0x71   : > { %v406_v29 = vsub.s32 %v403_v28, %v228_v9  ;;  %p722_p8 = scmp.lt.s32.totalorder %s1001_s24, %s720_s5  ;;  %p723_p12 = scmp.lt.s32.totalorder %s721_s6, %s715_s4 }
  0x72   : > { %p718_p4 = pneg %p717_p1 }
  0x73   : > { %p724_p3 = por %p723_p12, %p722_p8 }
  0x75   : > { %p725_p7 = pnand %p724_p3, %p718_p4 }
  0xfc   : > { %v221_v11 = vpop.xlane.xlu0 %220 }
  0xfd   : > { %v222_v12 = vmul.f32 0.00390625, %v221_v11 }
  0xff   : > { %v230_v13 = vrot.slane %v222_v12, %v229_v10 }
 0x101   : > { %547 = vmatmul.mubr.msk.f32.vlgmr.msra.gmra.mrb[0].mxu0 %vm231_vm2, %v230_v13 }
 0x1d4   : > { %v303_v15 = vpop.f32.mrb[0].mxu0 }
 0x1d5   : > { %v307_v16 = vmax.f32 %v303_v15, 0.0  ;;  %v548_v17 = vpop.f32.mrb[1].mxu0 }
 0x1d7   : > { %552 = vmatmul.mubr.msk.f32.vlgmr.msra.gmra.mrb[0].mxu1 %vm309_vm4, %v307_v16 }
 0x2aa   : > { %v383_v18 = vpop.f32.mrb[0].mxu1 }
 0x2ab   : > { %v532_v19 = vmul.f32 -1.442695, %v383_v18  ;;  %v553_v20 = vpop.f32.mrb[1].mxu1 }
 0x2ad   : > { %625 = vpow2.f32 %v532_v19 }
 0x2b7   : > { %v626_v21 = vpop.eup %625 }
 0x2b8   : > { %v390_v22 = vadd.f32 1.0, %v626_v21 }
 0x2ba   : > { %627 = vrcp.f32 %v390_v22 }
 0x2c4   : > { %v628_v24 = vpop.eup %627 }
 0x2c5   : > { %v396_v25 = vrot.slane %v628_v24, %v395_v23 }
 0x2c7   : > { %398 = vbcast.lane.b32.xlu0 %v396_v25, 256 }
 0x339   : > { %v399_v30 = vpop.permute.xlu0 %398 }
 0x33a   : > { %v407_v31 = vrot.slane %v399_v30, %v406_v29 }
 0x33c   : > { %v409_v32 = vmul.f32 %v407_v31, %v212_v0 }
 0x33e   : > { %410 = vst [vmem:[%s211_s20] sm:$0xff] %v409_v32 }
 0x33f   : > { %728 = shalt.err (!%p725_p7)
}
 0x340   : > { %s729_s8 = scalar_lea.hbm %s999_s28, 128  ;;  %s733_s11 = scalar_lea.hbm %s1046_s3, 256 }
 0x341   : > { %p730_p10 = scmp.ne.s32.totalorder %s999_s28, %s729_s8  ;;  %p734_p0 = scmp.lt.u32.totalorder %s999_s28, %s1046_s3 }
 0x342   : > { %p735_p11 = scmp.lt.u32.totalorder %s733_s11, %s729_s8  ;;  %p737_p2 = scmp.lt.u32.totalorder %s729_s8, %s999_s28 }
 0x343   : > { %p731_p13 = pnand %p730_p10, %p933_p6 }
 0x344   : > { %p736_p9 = por %p735_p11, %p734_p0 }
 0x345   : > { %p732_p5 = pneg %p731_p13 }
 0x346   : > { %p738_p1 = por %p737_p2, %p736_p9 }
 0x348   : > { %p739_p4 = pnand %p738_p1, %p732_p5 }
 0x34a   : > { %742 = shalt.err (!%p739_p4)
}
 0x34b   : > { %564 = dma.vmem_to_hbm [thread:$0]  (%p933_p6), %s1001_s24, 128, %s999_s28, %s412_s22  }
 0x34c PF: > { %s438_s29 = sand.u32 1, %s773_s12   ;;  %p1061_p8 = scmp.ne.s32.totalorder %s1051_s19, 0 }
 0x34d   : > { %p1062_p12 = scmp.ge.s32.totalorder %s785_s15, 2  ;;  %s439_s30 = scalar_lea.sflag [#allocation4], %s438_s29 }
 0x34f   : > { %p578_p3 = pnand %p1062_p12, %p1061_p8 }
 0x351   : > { %768 = dma.done.wait (!%p578_p3), %s439_s30, 128  }
 0x352   : > { %770 = vsyncadd (!%p578_p3), %s439_s30, 4294967168  ;;  %p17_p7 = scmp.ge.s32.totalorder %s870_s26, 4   ;;  %s1063_s12 = smov %s777_s13 }
 0x353   : > { %s1064_s13 = smov %s781_s14  ;;  %s1065_s14 = smov %s929_s25 }
 0x354   : > { %s1066_s15 = smov %s870_s26  ;;  %19 = sbr.rel (!%p17_p7) target bundleno = 6 (0x6), region = 85 }
 0x35b   :  { %444 = vsyncpa [#allocation3], 1 }
 0x35c   :  { %446 = vsyncpa [#allocation3 + $0x1], 1 }
 0x35d   :  { %447 = vsyncpa [#allocation6], 1 }
 0x35e   :  { %448 = vsyncpa [#allocation4], 1 }
 0x35f   :  { %450 = vsyncpa [#allocation4 + $0x1], 1 }

</bundles_post_ra>
